<compile_context>
chip_gen: v6e
topology: v6e:2x2x1
jax: 0.10.0
libtpu: 0.0.40
codegen_flags: <defaults>
</compile_context>

<pallas_src>
import copy

import jax
import jax.numpy as jnp
from jax import lax
from jax.experimental import pallas as pl
from jax.experimental.pallas import tpu as pltpu


# bf16 operands are MXU-native on v5e / v6e / v7x; accumulate + epilogue in f32.
_COMPUTE_DTYPE = jnp.bfloat16


# ----------------------------------------------------------------------------
# Pallas kernel: fused transposed GEMM + bias + ReLU  (the conv hot path)
# ----------------------------------------------------------------------------
def _gemm_bias_relu_kernel(a_ref, w_ref, b_ref, o_ref):
    # a_ref: (K, N*HW)   bf16  im2col^T, all pixels of all batch elems on lanes
    # w_ref: (Cout, K)   bf16  flattened OIHW weight
    # b_ref: (Cout, 1)   f32   bias column, broadcast along lanes
    # o_ref: (Cout, N*HW) f32  lane-dense output slab (multiple of 128 lanes)
    acc = jnp.dot(w_ref[...], a_ref[...],
                  preferred_element_type=jnp.float32)     # MXU, f32 accumulate
    acc = acc + b_ref[...]                                # VPU f32 epilogue
    o_ref[...] = jnp.maximum(acc, 0.0).astype(o_ref.dtype)


def conv_gemm_bias_relu(a_t2, w_flat, b_col):
    """a_t2: (K, N*HW) bf16, w_flat: (Cout, K) bf16, b_col: (Cout, 1) f32.

    Returns relu(w_flat @ a_t2 + b_col) -> (Cout, N*HW) f32.  Single grid step:
    the whole working set (<100 KiB) fits VMEM on every generation, so all
    per-step pipeline/DMA overhead is paid exactly once.
    """
    K, NHW = a_t2.shape
    Cout = w_flat.shape[0]

    flops = 2 * Cout * K * NHW
    bytes_accessed = (a_t2.size * a_t2.dtype.itemsize
                      + w_flat.size * w_flat.dtype.itemsize
                      + b_col.size * b_col.dtype.itemsize
                      + Cout * NHW * 4)

    return pl.pallas_call(
        _gemm_bias_relu_kernel,
        out_shape=jax.ShapeDtypeStruct((Cout, NHW), jnp.float32),
        grid=(1,),
        in_specs=[
            # Blocks cover the full array extents -> always layout-legal,
            # regardless of (8, 128) divisibility of K / Cout.
            pl.BlockSpec((K, NHW), lambda i: (0, 0)),     # A^T slab, lane-dense
            pl.BlockSpec((Cout, K), lambda i: (0, 0)),    # full (tiny) weight
            pl.BlockSpec((Cout, 1), lambda i: (0, 0)),    # bias column
        ],
        out_specs=pl.BlockSpec((Cout, NHW), lambda i: (0, 0)),
        cost_estimate=pl.CostEstimate(
            flops=flops, transcendentals=0, bytes_accessed=bytes_accessed),
    )(a_t2, w_flat, b_col)


# ----------------------------------------------------------------------------
# Fused forward: im2col (bf16, fused by XLA) -> Pallas GEMM+bias+ReLU -> NCHW
# ----------------------------------------------------------------------------
@jax.jit
def _conv3x3_bias_relu(x, weight, bias):
    N, C, H, W = x.shape
    Cout, _, kh, kw = weight.shape
    K = C * kh * kw

    # --- glue: im2col^T produced directly in bf16 (cast fuses into the pad /
    # stack / reshape fusion; no standalone f32->bf16 convert pass in HBM) ---
    x_b = x.astype(_COMPUTE_DTYPE)
    x_pad = jnp.pad(x_b, ((0, 0), (0, 0), (1, 1), (1, 1)))
    patches = jnp.stack(
        [x_pad[:, :, i:i + H, j:j + W] for i in range(kh) for j in range(kw)],
        axis=2)                                           # (N, C, 9, H, W)
    a_t = patches.reshape(N, K, H * W)                    # (N, K, HW)
    # Fold N into the lane axis -> one grid step, 512-wide lane-dense store.
    a_t2 = jnp.transpose(a_t, (1, 0, 2)).reshape(K, N * H * W)   # (K, N*HW)

    w_flat = weight.reshape(Cout, K).astype(_COMPUTE_DTYPE)      # (Cout, K)
    b_col = bias.reshape(Cout, 1).astype(jnp.float32)            # (Cout, 1)

    # --- hot path: Pallas transposed GEMM + bias + ReLU (single invocation) ---
    out = conv_gemm_bias_relu(a_t2, w_flat, b_col)        # (Cout, N*HW) f32

    # --- glue: back to NCHW (tiny 8x2 outer-dim transpose, fused by XLA) ---
    return jnp.transpose(out.reshape(Cout, N, H, W), (1, 0, 2, 3))


# ----------------------------------------------------------------------------
# The "child" module built by ModelBuilder: Conv2d(3x3, pad=1) + ReLU
# ----------------------------------------------------------------------------
class ConvBNReLU:
    """Conv2d(in_ch, out_ch, 3, stride=1, padding=1, bias=True) + ReLU."""

    def __init__(self, in_channels, out_channels, key):
        kh = kw = 3
        w_key, b_key = jax.random.split(key)
        fan_in = in_channels * kh * kw
        bound = 1.0 / float(fan_in) ** 0.5
        # Deterministic init (PyTorch-like uniform bound), weight in OIHW.
        self.weight = jax.random.uniform(
            w_key, (out_channels, in_channels, kh, kw),
            minval=-bound, maxval=bound, dtype=jnp.float32)
        self.bias = jax.random.uniform(
            b_key, (out_channels,), minval=-bound, maxval=bound,
            dtype=jnp.float32)
        self.in_channels = in_channels
        self.out_channels = out_channels

    def __call__(self, x):
        return _conv3x3_bias_relu(x, self.weight, self.bias)


# ----------------------------------------------------------------------------
# ModelBuilder: mirrors the PyTorch module's structure and forward semantics
# ----------------------------------------------------------------------------
_REGISTRY = {
    # TODO(synk): importlib-based dynamic class loading replaced by a static
    # registry for this synthetic, self-contained script.
    "kdccb.blocks.ConvBNReLU": ConvBNReLU,
}


class ModelBuilder:
    def __init__(self, cfg, key):
        net_name = cfg["name"]
        net_sub_name = cfg["subname"]
        kwargs = cfg["kwargs"]
        net = self.build(net_sub_name, dict(kwargs, key=key))
        self._children = {net_name: net}

    def build(self, mname, kwargs):
        cls = _REGISTRY[mname]
        return cls(**kwargs)

    def forward(self, x):
        x = copy.copy(x)
        output = None
        for submodule in self._children.values():
            output = submodule(x)
        return output

    __call__ = forward


# ----------------------------------------------------------------------------
# Main
# ----------------------------------------------------------------------------
if __name__ == "__main__":
    key = jax.random.PRNGKey(0)
    k_params, k_input = jax.random.split(key)

    cfg = {
        "name": "backbone",
        "subname": "kdccb.blocks.ConvBNReLU",
        "kwargs": {"in_channels": 4, "out_channels": 8},
    }
    model = ModelBuilder(cfg, k_params)

    # NCHW input, small shapes: N=2, C=4, H=W=16
    x = jax.random.normal(k_input, (2, 4, 16, 16), dtype=jnp.float32)

    out = model(x)
    out = jax.block_until_ready(out)

    # Reference check against XLA conv (correctness of the Pallas path).
    child = model._children["backbone"]
    ref = lax.conv_general_dilated(
        x, child.weight, window_strides=(1, 1), padding=((1, 1), (1, 1)),
        dimension_numbers=("NCHW", "OIHW", "NCHW"))
    ref = jnp.maximum(ref + child.bias.reshape(1, -1, 1, 1), 0.0)

    assert out.shape == (2, 8, 16, 16)
    # bf16 operands (36-term dot, f32 accumulate) -> loose-ish tolerance.
    assert jnp.allclose(out, ref, atol=5e-2, rtol=5e-2)

    print("KERNEL_OK")
</pallas_src>

<mosaic_0001>
module attributes {stable_mosaic.version = 11 : i64} {
  func.func @_gemm_bias_relu_kernel(%arg0: i32, %arg1: memref<36x512xbf16, #tpu.memory_space<vmem>>, %arg2: memref<8x36xbf16, #tpu.memory_space<vmem>>, %arg3: memref<8x1xf32, #tpu.memory_space<vmem>>, %arg4: memref<8x512xf32, #tpu.memory_space<vmem>>) attributes {dimension_semantics = [#tpu.dimension_semantics<arbitrary>], iteration_bounds = array<i64: 1>, scalar_prefetch = 0 : i64, scratch_operands = 0 : i64, tpu.core_type = #tpu.core_type<tc>, window_params = [{pipeline_mode = #tpu.pipeline_mode<synchronous>, transform_indices = @transform_0, window_bounds = array<i64: 36, 512>}, {pipeline_mode = #tpu.pipeline_mode<synchronous>, transform_indices = @transform_1, window_bounds = array<i64: 8, 36>}, {pipeline_mode = #tpu.pipeline_mode<synchronous>, transform_indices = @transform_2, window_bounds = array<i64: 8, 1>}, {pipeline_mode = #tpu.pipeline_mode<synchronous>, transform_indices = @transform_3, window_bounds = array<i64: 8, 512>}]} {
    %c0 = arith.constant 0 : index
    %c0_0 = arith.constant 0 : index
    %0 = vector.load %arg2[%c0, %c0_0] : memref<8x36xbf16, #tpu.memory_space<vmem>>, vector<8x36xbf16>
    %c0_1 = arith.constant 0 : index
    %c0_2 = arith.constant 0 : index
    %1 = vector.load %arg1[%c0_1, %c0_2] : memref<36x512xbf16, #tpu.memory_space<vmem>>, vector<36x512xbf16>
    %cst = arith.constant dense<0.000000e+00> : vector<8x512xf32>
    %2 = tpu.matmul %0, %1, %cst {dimension_numbers = #tpu.dot_dimension_numbers<[1], [0], [0], [1], [0, 0, 1, 1], [], []>} : vector<8x36xbf16>, vector<36x512xbf16>, vector<8x512xf32> -> vector<8x512xf32>
    %c0_3 = arith.constant 0 : index
    %c0_4 = arith.constant 0 : index
    %3 = vector.load %arg3[%c0_3, %c0_4] : memref<8x1xf32, #tpu.memory_space<vmem>>, vector<8x1xf32>
    %4 = vector.broadcast %3 : vector<8x1xf32> to vector<8x512xf32>
    %5 = arith.addf %2, %4 : vector<8x512xf32>
    %cst_5 = arith.constant 0.000000e+00 : f32
    %6 = vector.broadcast %cst_5 : f32 to vector<8x512xf32>
    %7 = arith.maximumf %5, %6 : vector<8x512xf32>
    %c0_6 = arith.constant 0 : index
    %c0_7 = arith.constant 0 : index
    %8 = vector.load %arg4[%c0_6, %c0_7] : memref<8x512xf32, #tpu.memory_space<vmem>>, vector<8x512xf32>
    tpu.vector_store %arg4[%c0_6, %c0_7], %7 {strides = array<i32>} : memref<8x512xf32, #tpu.memory_space<vmem>>, vector<8x512xf32>,
    return
  }
  func.func @transform_0(%arg0: i32) -> (i32, i32) {
    %c0_i32 = arith.constant 0 : i32
    %c0_i32_0 = arith.constant 0 : i32
    %c0_i32_1 = arith.constant 0 : i32
    return %c0_i32, %c0_i32_0 : i32, i32
  }
  func.func @transform_1(%arg0: i32) -> (i32, i32) {
    %c0_i32 = arith.constant 0 : i32
    %c0_i32_0 = arith.constant 0 : i32
    %c0_i32_1 = arith.constant 0 : i32
    return %c0_i32, %c0_i32_0 : i32, i32
  }
  func.func @transform_2(%arg0: i32) -> (i32, i32) {
    %c0_i32 = arith.constant 0 : i32
    %c0_i32_0 = arith.constant 0 : i32
    %c0_i32_1 = arith.constant 0 : i32
    return %c0_i32, %c0_i32_0 : i32, i32
  }
  func.func @transform_3(%arg0: i32) -> (i32, i32) {
    %c0_i32 = arith.constant 0 : i32
    %c0_i32_0 = arith.constant 0 : i32
    %c0_i32_1 = arith.constant 0 : i32
    return %c0_i32, %c0_i32_0 : i32, i32
  }
}

</mosaic_0001>

<bundles_post_ra>
// kernel: _conv3x3_bias_relu.1
= control target key start
LH: loop header
LB: loop body
LE: loop exit
PB: predicated region body
PF: predicated region fallthrough
CT: control target
= control target key end

     0   :  { %vm86_vm0 = vcmask 1041408   ;;  %v227_v2 = vmov 0   ;;  %vm82_vm1 = vcmask 293888   ;;  %s296_s0 = inlined_call_operand.vmem [shape: bf16[36,512], index: 0, kind: input, shape index: {}]   ;;  %s297_s2 = inlined_call_operand.vmem [shape: f32[8,1], index: 2, kind: input, shape index: {}]   ;;  %s298_s1 = inlined_call_operand.vmem [shape: bf16[8,36], index: 1, kind: input, shape index: {}]   ;;  %s299_s3 = inlined_call_operand.vmem [shape: f32[8,512], index: 3, kind: output, shape index: {}]  }
   0x1   :  { %v24_v0 = vld [vmem:[%s296_s0 + $0x40] sm:$0x33]  ;;  %v25_v1 = vld [vmem:[%s296_s0 + $0x48] sm:$0x33]  ;;  %131 = vmatprep.mubr.bf16.mxu0 %v227_v2  ;;  %172 = vmatprep.mubr.bf16.mxu1 %v227_v2 }
   0x2   :  { %v202_v3 = vcombine.high %v24_v0, %v24_v0  ;;  %v204_v4 = vcombine.high %v25_v1, %v25_v1  ;;  %v201_v5 = vcombine.low %v24_v0, %v24_v0  ;;  %v203_v6 = vcombine.low %v25_v1, %v25_v1  ;;  %v215_v7 = vld [vmem:[%s296_s0 + $0x24] ss:$16 sps:$4 sm:$0xff]   ;;  %210 = vset.pattern.permute.xlu0 %v227_v2  ;;  %v217_v8 = vld [vmem:[%s296_s0 + $0x2c] ss:$16 sps:$4 sm:$0xff]   ;;  %v219_v11 = vld [vmem:[%s296_s0 + $0x20] ss:$16 sps:$4 sm:$0xff]  }
   0x3   :  { %v220_v12 = vld [vmem:[%s296_s0 + $0x28] ss:$16 sps:$4 sm:$0xff]   ;;  %v221_v13 = vld [vmem:[%s296_s0 + $0x4] ss:$16 sps:$4 sm:$0xff]   ;;  %v223_v14 = vld [vmem:[%s296_s0 + $0xc] ss:$16 sps:$4 sm:$0xff]  }
   0x4   :  { %205 = vmatprep.subr.msk.bf16.mxu0 %vm86_vm0, %v202_v3  ;;  %207 = vmatprep.subr.msk.bf16.mxu1 %vm86_vm0, %v204_v4  ;;  %v88_v9 = vsel %vm86_vm0, %v201_v5, 0  ;;  %v94_v10 = vsel %vm86_vm0, %v203_v6, 0  ;;  %v26_v15 = vld [vmem:[%s297_s2] sm:$0xff]  ;;  %v226_v17 = vld [vmem:[%s296_s0 + $0x8] ss:$16 sps:$4 sm:$0xff]  }
   0x5   :  { %110 = vmatpush1.bf16.msra.mxu0 %v88_v9  ;;  %151 = vmatpush1.bf16.msra.mxu1 %v94_v10  ;;  %v225_v16 = vld [vmem:[%s296_s0] ss:$16 sps:$4 sm:$0xff]  }
   0x6   :  { %111 = vmatprep.subr.bf16.mxu0 %v215_v7  ;;  %152 = vmatprep.subr.bf16.mxu1 %v217_v8  ;;  %v15_v18 = vld [vmem:[%s298_s1] sm:$0xf] }
   0x7   :  { %29 = vperm.xlu0 %210, %v26_v15  }
   0x9   :  { %112 = vmatpush1.bf16.msra.mxu0 %v219_v11  ;;  %153 = vmatpush1.bf16.msra.mxu1 %v220_v12 }
   0xa   :  { %113 = vmatprep.subr.bf16.mxu0 %v221_v13  ;;  %154 = vmatprep.subr.bf16.mxu1 %v223_v14 }
   0xd   :  { %114 = vmatpush1.bf16.msra.mxu0 %v225_v16  ;;  %155 = vmatpush1.bf16.msra.mxu1 %v226_v17 }
  0x10   :  { %206 = vmatmul.mubr.msk.bf16.vlgmr.msra.gmra.mxu0 %vm82_vm1, %v15_v18  ;;  %208 = vmatmul.mubr.msk.bf16.vlgmr.msra.gmra.mxu1 %vm82_vm1, %v15_v18 }
  0x82   :  { %v30_v19 = vpop.permute.xlu0 %29 }
  0xd0   :  { %v133_v20 = vpop.f32.mrf.mxu0  ;;  %v174_v21 = vpop.f32.mrf.mxu1 }
  0xd1   :  { %v134_v22 = vadd.f32 %v133_v20, %v30_v19  ;;  %v175_v23 = vadd.f32 %v174_v21, %v30_v19 }
  0xd2   :  { %v135_v24 = vpop.f32.mrf.mxu0  ;;  %v176_v25 = vpop.f32.mrf.mxu1 }
  0xd3   :  { %v181_v26 = vmax.f32 %v134_v22, 0.0  ;;  %v183_v27 = vmax.f32 %v175_v23, 0.0  ;;  %v136_v28 = vadd.f32 %v135_v24, %v30_v19  ;;  %v177_v29 = vadd.f32 %v176_v25, %v30_v19 }
  0xd4   :  { %v137_v30 = vpop.f32.mrf.mxu0  ;;  %v178_v31 = vpop.f32.mrf.mxu1 }
  0xd5   :  { %185 = vst [vmem:[%s299_s3] sm:$0xff] %v181_v26  ;;  %187 = vst [vmem:[%s299_s3 + $0x10] sm:$0xff] %v183_v27  ;;  %v182_v32 = vmax.f32 %v136_v28, 0.0  ;;  %v184_v33 = vmax.f32 %v177_v29, 0.0 }
  0xd6   :  { %v138_v34 = vpop.f32.mrf.mxu0  ;;  %v179_v35 = vpop.f32.mrf.mxu1 }
  0xd7   :  { %186 = vst [vmem:[%s299_s3 + $0x8] sm:$0xff] %v182_v32  ;;  %188 = vst [vmem:[%s299_s3 + $0x18] sm:$0xff] %v184_v33 }

</bundles_post_ra>
